<compile_context>
chip_gen: v6e
topology: v6e:2x2x1
jax: 0.10.0
libtpu: 0.0.40
codegen_flags: <defaults>
</compile_context>

<pallas_src>
import math
from functools import partial

import jax
import jax.numpy as jnp
from jax.experimental import pallas as pl
from jax.experimental.pallas import tpu as pltpu


def mlp9_kernel(xt_ref, w1_ref, b1_ref, wh_ref, bh_ref, w9_ref, b9_ref, o_ref):
    """Transposed-activation 9-layer MLP.

    Activations live as (features, batch_tile): features on sublanes, batch on
    lanes, so every tile is lane-dense.  8x (Linear+ReLU) on the MXU (bf16
    operands, f32 accumulation), final hidden->1 layer on the VPU/XLU,
    sigmoid on the EUP.
    """
    # Layer 1: (hidden, in) @ (in, tb) -> (hidden, tb), f32 accumulation.
    h = jnp.dot(w1_ref[...], xt_ref[...].astype(jnp.bfloat16),
                preferred_element_type=jnp.float32) + b1_ref[...]
    h = jnp.maximum(h, 0.0)

    # Layers 2..8: statically unrolled over the stacked (7, hidden, hidden) weights.
    for i in range(wh_ref.shape[0]):
        h = jnp.dot(wh_ref[i], h.astype(jnp.bfloat16),
                    preferred_element_type=jnp.float32) + bh_ref[i]
        h = jnp.maximum(h, 0.0)

    # Layer 9 (hidden -> 1): keep it off the MXU.  Broadcast multiply (VPU) +
    # sublane reduce (XLU) in f32; result (1, tb) is a lane-dense output store.
    z = jnp.sum(h * w9_ref[...], axis=0, keepdims=True) + b9_ref[...]
    o_ref[...] = jax.nn.sigmoid(z)


def prepare_params(params):
    """One-time conversion of PyTorch-layout params to kernel-ready arrays.

    params: list of 9 (W (out, in) f32, b (out,) f32) tuples (nn.Linear layout).
    Call ONCE and reuse: stacks the 7 identically-shaped hidden layers, pre-casts
    MXU weight operands to bf16 and reshapes biases to column vectors for the
    transposed-activation kernel.
    """
    (w1, b1), *hidden, (w9, b9) = params
    out_dim = w9.shape[0]
    # The final layer is computed as a VPU mul + sublane reduce.
    assert out_dim == 1, "kernel's final layer assumes output_dim == 1"
    wh = jnp.stack([w for w, _ in hidden])                    # (7, hidden, hidden)
    bh = jnp.stack([b for _, b in hidden])[:, :, None]        # (7, hidden, 1)
    return dict(
        w1=w1.astype(jnp.bfloat16),                           # (hidden, in)
        b1=b1[:, None].astype(jnp.float32),                   # (hidden, 1)
        wh=wh.astype(jnp.bfloat16),                           # (7, hidden, hidden)
        bh=bh.astype(jnp.float32),                            # (7, hidden, 1)
        w9=w9.T.astype(jnp.float32),                          # (hidden, 1)
        b9=b9[:, None].astype(jnp.float32),                   # (1, 1)
    )


def _round_up(n, m):
    return ((n + m - 1) // m) * m


@partial(jax.jit, static_argnames=("tile_b",))
def neural_network9_forward(x, prep, tile_b=4096):
    """x: (B, input_dim) f32.  prep: output of prepare_params().  Returns (B, 1) f32."""
    B, in_dim = x.shape
    hidden_dim = prep["w1"].shape[0]
    out_dim = prep["b9"].shape[0]
    n_hid = prep["wh"].shape[0]
    assert tile_b % 128 == 0

    # Batch-tile selection.  The batch sits on the lane dim of every per-step
    # tile, so tb must be a multiple of 128 unless the whole batch is a single
    # block.  For B >= 1024 force >= 2 grid steps so dimension_semantics=
    # ("parallel",) can shard across v7x's two TensorCores.
    if B <= tile_b:
        if B >= 1024:
            tb = min(tile_b, _round_up(pl.cdiv(B, 2), 128))
        else:
            tb = B                       # single block; block dims == full dims
    else:
        tb = tile_b
    grid = (pl.cdiv(B, tb),)             # no jnp.pad: Pallas masks the partial last block

    # Transposed, lane-dense layout: x tile is (in_dim, tb) (4->8 sublane pad
    # only, ~32x smaller than a (tb, 4) tile), activations (hidden, tb), output
    # (1, tb).  The wrapper transpose is one cheap pass over a (B, 4) array.
    xt = x.T                             # (in_dim, B)

    cost = pl.CostEstimate(
        flops=2 * B * (in_dim * hidden_dim
                       + n_hid * hidden_dim * hidden_dim
                       + hidden_dim * out_dim),
        transcendentals=B * out_dim,
        bytes_accessed=(4 * x.size
                        + 2 * (prep["w1"].size + prep["wh"].size)      # bf16 weights
                        + 4 * (prep["b1"].size + prep["bh"].size
                               + prep["w9"].size + prep["b9"].size)
                        + 4 * B * out_dim),
    )

    out_t = pl.pallas_call(
        mlp9_kernel,
        out_shape=jax.ShapeDtypeStruct((out_dim, B), jnp.float32),
        grid=grid,
        in_specs=[
            pl.BlockSpec((in_dim, tb), lambda i: (0, i)),       # x^T: tiled over batch lanes
            pl.BlockSpec(prep["w1"].shape, lambda i: (0, 0)),   # weights: VMEM-resident
            pl.BlockSpec(prep["b1"].shape, lambda i: (0, 0)),
            pl.BlockSpec(prep["wh"].shape, lambda i: (0, 0, 0)),
            pl.BlockSpec(prep["bh"].shape, lambda i: (0, 0, 0)),
            pl.BlockSpec(prep["w9"].shape, lambda i: (0, 0)),
            pl.BlockSpec(prep["b9"].shape, lambda i: (0, 0)),
        ],
        out_specs=pl.BlockSpec((out_dim, tb), lambda i: (0, i)),  # lane-dense output
        compiler_params=pltpu.CompilerParams(
            dimension_semantics=("parallel",),                    # batch-parallel (v7x megacore)
            # Lane-padded per-batch-element footprint is ~0.5-1 KiB (double-
            # buffered x/out tiles + f32/bf16 activations + temps), so 32 MiB
            # covers tile_b up to ~16K while staying inside v7x's 64 MiB VMEM.
            vmem_limit_bytes=32 * 1024 * 1024,
        ),
        cost_estimate=cost,
    )(xt, prep["w1"], prep["b1"], prep["wh"], prep["bh"], prep["w9"], prep["b9"])

    return out_t.T                       # (B, out_dim)


def init_params(key, input_dim, hidden_dim, output_dim):
    """PyTorch-layout params: list of (W (out, in), b (out,)).
    layer_1 uses kaiming_uniform_(nonlinearity='relu'); others nn.Linear default."""
    dims = [input_dim] + [hidden_dim] * 8 + [output_dim]
    params = []
    for i in range(9):
        fan_in, fan_out = dims[i], dims[i + 1]
        key, kw, kb = jax.random.split(key, 3)
        if i == 0:
            bound_w = math.sqrt(6.0 / fan_in)            # kaiming_uniform_, relu gain
        else:
            bound_w = 1.0 / math.sqrt(fan_in)            # nn.Linear default
        w = jax.random.uniform(kw, (fan_out, fan_in), jnp.float32, -bound_w, bound_w)
        bound_b = 1.0 / math.sqrt(fan_in)
        b = jax.random.uniform(kb, (fan_out,), jnp.float32, -bound_b, bound_b)
        params.append((w, b))
    return params


if __name__ == "__main__":
    input_dim = 4
    hidden_dim = 32
    output_dim = 1
    batch = 8

    key = jax.random.PRNGKey(0)
    key, kx = jax.random.split(key)
    x = jax.random.normal(kx, (batch, input_dim), dtype=jnp.float32)

    params = init_params(key, input_dim, hidden_dim, output_dim)
    prep = prepare_params(params)        # hoisted one-time weight prep (do NOT redo per call)

    out = neural_network9_forward(x, prep)
    out = jax.block_until_ready(out)
    assert out.shape == (batch, output_dim)

    # Reference 1 (tight): mirrors the kernel's transposed bf16-operand /
    # f32-accumulate matmuls and the f32 final layer.
    h = x.T
    for i, (w, b) in enumerate(params):
        if i < 8:
            z = jnp.dot(w.astype(jnp.bfloat16), h.astype(jnp.bfloat16),
                        preferred_element_type=jnp.float32) + b[:, None]
            h = jnp.maximum(z, 0.0)
        else:
            z = jnp.sum(h * w.T, axis=0, keepdims=True) + b[:, None]
            h = jax.nn.sigmoid(z)
    ref_bf16 = h.T
    assert jnp.allclose(out, ref_bf16, atol=2e-3, rtol=2e-3)

    # Reference 2 (loose): pure-f32 PyTorch semantics.  bf16 matmul operands are
    # an intentional accuracy tradeoff vs. exact f32 parity.
    hf = x
    for i, (w, b) in enumerate(params):
        z = hf @ w.T + b
        hf = jax.nn.sigmoid(z) if i == 8 else jnp.maximum(z, 0.0)
    assert jnp.allclose(out, hf, atol=5e-2, rtol=5e-2)

    print("KERNEL_OK")
</pallas_src>

<mosaic_0001>
module attributes {stable_mosaic.version = 11 : i64} {
  func.func @mlp9_kernel(%arg0: i32, %arg1: memref<4x8xf32, #tpu.memory_space<vmem>>, %arg2: memref<32x4xbf16, #tpu.memory_space<vmem>>, %arg3: memref<32x1xf32, #tpu.memory_space<vmem>>, %arg4: memref<7x32x32xbf16, #tpu.memory_space<vmem>>, %arg5: memref<7x32x1xf32, #tpu.memory_space<vmem>>, %arg6: memref<32x1xf32, #tpu.memory_space<vmem>>, %arg7: memref<1x1xf32, #tpu.memory_space<vmem>>, %arg8: memref<1x8xf32, #tpu.memory_space<vmem>>) attributes {dimension_semantics = [#tpu.dimension_semantics<parallel>], iteration_bounds = array<i64: 1>, scalar_prefetch = 0 : i64, scratch_operands = 0 : i64, tpu.core_type = #tpu.core_type<tc>, window_params = [{transform_indices = @transform_0, window_bounds = array<i64: 4, 8>}, {pipeline_mode = #tpu.pipeline_mode<synchronous>, transform_indices = @transform_1, window_bounds = array<i64: 32, 4>}, {pipeline_mode = #tpu.pipeline_mode<synchronous>, transform_indices = @transform_2, window_bounds = array<i64: 32, 1>}, {pipeline_mode = #tpu.pipeline_mode<synchronous>, transform_indices = @transform_3, window_bounds = array<i64: 7, 32, 32>}, {pipeline_mode = #tpu.pipeline_mode<synchronous>, transform_indices = @transform_4, window_bounds = array<i64: 7, 32, 1>}, {pipeline_mode = #tpu.pipeline_mode<synchronous>, transform_indices = @transform_5, window_bounds = array<i64: 32, 1>}, {pipeline_mode = #tpu.pipeline_mode<synchronous>, transform_indices = @transform_6, window_bounds = array<i64: 1, 1>}, {transform_indices = @transform_7, window_bounds = array<i64: 1, 8>}]} {
    %c0 = arith.constant 0 : index
    %c0_0 = arith.constant 0 : index
    %0 = vector.load %arg2[%c0, %c0_0] : memref<32x4xbf16, #tpu.memory_space<vmem>>, vector<32x4xbf16>
    %c0_1 = arith.constant 0 : index
    %c0_2 = arith.constant 0 : index
    %1 = vector.load %arg1[%c0_1, %c0_2] : memref<4x8xf32, #tpu.memory_space<vmem>>, vector<4x8xf32>
    %2 = arith.truncf %1 : vector<4x8xf32> to vector<4x8xbf16>
    %cst = arith.constant dense<0.000000e+00> : vector<32x8xf32>
    %3 = tpu.matmul %0, %2, %cst {dimension_numbers = #tpu.dot_dimension_numbers<[1], [0], [0], [1], [0, 0, 1, 1], [], []>} : vector<32x4xbf16>, vector<4x8xbf16>, vector<32x8xf32> -> vector<32x8xf32>
    %c0_3 = arith.constant 0 : index
    %c0_4 = arith.constant 0 : index
    %4 = vector.load %arg3[%c0_3, %c0_4] : memref<32x1xf32, #tpu.memory_space<vmem>>, vector<32x1xf32>
    %5 = vector.broadcast %4 : vector<32x1xf32> to vector<32x8xf32>
    %6 = arith.addf %3, %5 : vector<32x8xf32>
    %cst_5 = arith.constant 0.000000e+00 : f32
    %7 = vector.broadcast %cst_5 : f32 to vector<32x8xf32>
    %8 = arith.maximumf %6, %7 : vector<32x8xf32>
    %c0_6 = arith.constant 0 : index
    %c0_7 = arith.constant 0 : index
    %c0_8 = arith.constant 0 : index
    %9 = vector.load %arg4[%c0_6, %c0_7, %c0_8] : memref<7x32x32xbf16, #tpu.memory_space<vmem>>, vector<1x32x32xbf16>
    %10 = vector.shape_cast %9 : vector<1x32x32xbf16> to vector<32x32xbf16>
    %11 = arith.truncf %8 : vector<32x8xf32> to vector<32x8xbf16>
    %cst_9 = arith.constant dense<0.000000e+00> : vector<32x8xf32>
    %12 = tpu.matmul %10, %11, %cst_9 {dimension_numbers = #tpu.dot_dimension_numbers<[1], [0], [0], [1], [0, 0, 1, 1], [], []>} : vector<32x32xbf16>, vector<32x8xbf16>, vector<32x8xf32> -> vector<32x8xf32>
    %c0_10 = arith.constant 0 : index
    %c0_11 = arith.constant 0 : index
    %c0_12 = arith.constant 0 : index
    %13 = vector.load %arg5[%c0_10, %c0_11, %c0_12] : memref<7x32x1xf32, #tpu.memory_space<vmem>>, vector<1x32x1xf32>
    %14 = vector.shape_cast %13 : vector<1x32x1xf32> to vector<32x1xf32>
    %15 = vector.broadcast %14 : vector<32x1xf32> to vector<32x8xf32>
    %16 = arith.addf %12, %15 : vector<32x8xf32>
    %cst_13 = arith.constant 0.000000e+00 : f32
    %17 = vector.broadcast %cst_13 : f32 to vector<32x8xf32>
    %18 = arith.maximumf %16, %17 : vector<32x8xf32>
    %c1 = arith.constant 1 : index
    %c0_14 = arith.constant 0 : index
    %c0_15 = arith.constant 0 : index
    %19 = vector.load %arg4[%c1, %c0_14, %c0_15] : memref<7x32x32xbf16, #tpu.memory_space<vmem>>, vector<1x32x32xbf16>
    %20 = vector.shape_cast %19 : vector<1x32x32xbf16> to vector<32x32xbf16>
    %21 = arith.truncf %18 : vector<32x8xf32> to vector<32x8xbf16>
    %cst_16 = arith.constant dense<0.000000e+00> : vector<32x8xf32>
    %22 = tpu.matmul %20, %21, %cst_16 {dimension_numbers = #tpu.dot_dimension_numbers<[1], [0], [0], [1], [0, 0, 1, 1], [], []>} : vector<32x32xbf16>, vector<32x8xbf16>, vector<32x8xf32> -> vector<32x8xf32>
    %c1_17 = arith.constant 1 : index
    %c0_18 = arith.constant 0 : index
    %c0_19 = arith.constant 0 : index
    %23 = vector.load %arg5[%c1_17, %c0_18, %c0_19] : memref<7x32x1xf32, #tpu.memory_space<vmem>>, vector<1x32x1xf32>
    %24 = vector.shape_cast %23 : vector<1x32x1xf32> to vector<32x1xf32>
    %25 = vector.broadcast %24 : vector<32x1xf32> to vector<32x8xf32>
    %26 = arith.addf %22, %25 : vector<32x8xf32>
    %cst_20 = arith.constant 0.000000e+00 : f32
    %27 = vector.broadcast %cst_20 : f32 to vector<32x8xf32>
    %28 = arith.maximumf %26, %27 : vector<32x8xf32>
    %c2 = arith.constant 2 : index
    %c0_21 = arith.constant 0 : index
    %c0_22 = arith.constant 0 : index
    %29 = vector.load %arg4[%c2, %c0_21, %c0_22] : memref<7x32x32xbf16, #tpu.memory_space<vmem>>, vector<1x32x32xbf16>
    %30 = vector.shape_cast %29 : vector<1x32x32xbf16> to vector<32x32xbf16>
    %31 = arith.truncf %28 : vector<32x8xf32> to vector<32x8xbf16>
    %cst_23 = arith.constant dense<0.000000e+00> : vector<32x8xf32>
    %32 = tpu.matmul %30, %31, %cst_23 {dimension_numbers = #tpu.dot_dimension_numbers<[1], [0], [0], [1], [0, 0, 1, 1], [], []>} : vector<32x32xbf16>, vector<32x8xbf16>, vector<32x8xf32> -> vector<32x8xf32>
    %c2_24 = arith.constant 2 : index
    %c0_25 = arith.constant 0 : index
    %c0_26 = arith.constant 0 : index
    %33 = vector.load %arg5[%c2_24, %c0_25, %c0_26] : memref<7x32x1xf32, #tpu.memory_space<vmem>>, vector<1x32x1xf32>
    %34 = vector.shape_cast %33 : vector<1x32x1xf32> to vector<32x1xf32>
    %35 = vector.broadcast %34 : vector<32x1xf32> to vector<32x8xf32>
    %36 = arith.addf %32, %35 : vector<32x8xf32>
    %cst_27 = arith.constant 0.000000e+00 : f32
    %37 = vector.broadcast %cst_27 : f32 to vector<32x8xf32>
    %38 = arith.maximumf %36, %37 : vector<32x8xf32>
    %c3 = arith.constant 3 : index
    %c0_28 = arith.constant 0 : index
    %c0_29 = arith.constant 0 : index
    %39 = vector.load %arg4[%c3, %c0_28, %c0_29] : memref<7x32x32xbf16, #tpu.memory_space<vmem>>, vector<1x32x32xbf16>
    %40 = vector.shape_cast %39 : vector<1x32x32xbf16> to vector<32x32xbf16>
    %41 = arith.truncf %38 : vector<32x8xf32> to vector<32x8xbf16>
    %cst_30 = arith.constant dense<0.000000e+00> : vector<32x8xf32>
    %42 = tpu.matmul %40, %41, %cst_30 {dimension_numbers = #tpu.dot_dimension_numbers<[1], [0], [0], [1], [0, 0, 1, 1], [], []>} : vector<32x32xbf16>, vector<32x8xbf16>, vector<32x8xf32> -> vector<32x8xf32>
    %c3_31 = arith.constant 3 : index
    %c0_32 = arith.constant 0 : index
    %c0_33 = arith.constant 0 : index
    %43 = vector.load %arg5[%c3_31, %c0_32, %c0_33] : memref<7x32x1xf32, #tpu.memory_space<vmem>>, vector<1x32x1xf32>
    %44 = vector.shape_cast %43 : vector<1x32x1xf32> to vector<32x1xf32>
    %45 = vector.broadcast %44 : vector<32x1xf32> to vector<32x8xf32>
    %46 = arith.addf %42, %45 : vector<32x8xf32>
    %cst_34 = arith.constant 0.000000e+00 : f32
    %47 = vector.broadcast %cst_34 : f32 to vector<32x8xf32>
    %48 = arith.maximumf %46, %47 : vector<32x8xf32>
    %c4 = arith.constant 4 : index
    %c0_35 = arith.constant 0 : index
    %c0_36 = arith.constant 0 : index
    %49 = vector.load %arg4[%c4, %c0_35, %c0_36] : memref<7x32x32xbf16, #tpu.memory_space<vmem>>, vector<1x32x32xbf16>
    %50 = vector.shape_cast %49 : vector<1x32x32xbf16> to vector<32x32xbf16>
    %51 = arith.truncf %48 : vector<32x8xf32> to vector<32x8xbf16>
    %cst_37 = arith.constant dense<0.000000e+00> : vector<32x8xf32>
    %52 = tpu.matmul %50, %51, %cst_37 {dimension_numbers = #tpu.dot_dimension_numbers<[1], [0], [0], [1], [0, 0, 1, 1], [], []>} : vector<32x32xbf16>, vector<32x8xbf16>, vector<32x8xf32> -> vector<32x8xf32>
    %c4_38 = arith.constant 4 : index
    %c0_39 = arith.constant 0 : index
    %c0_40 = arith.constant 0 : index
    %53 = vector.load %arg5[%c4_38, %c0_39, %c0_40] : memref<7x32x1xf32, #tpu.memory_space<vmem>>, vector<1x32x1xf32>
    %54 = vector.shape_cast %53 : vector<1x32x1xf32> to vector<32x1xf32>
    %55 = vector.broadcast %54 : vector<32x1xf32> to vector<32x8xf32>
    %56 = arith.addf %52, %55 : vector<32x8xf32>
    %cst_41 = arith.constant 0.000000e+00 : f32
    %57 = vector.broadcast %cst_41 : f32 to vector<32x8xf32>
    %58 = arith.maximumf %56, %57 : vector<32x8xf32>
    %c5 = arith.constant 5 : index
    %c0_42 = arith.constant 0 : index
    %c0_43 = arith.constant 0 : index
    %59 = vector.load %arg4[%c5, %c0_42, %c0_43] : memref<7x32x32xbf16, #tpu.memory_space<vmem>>, vector<1x32x32xbf16>
    %60 = vector.shape_cast %59 : vector<1x32x32xbf16> to vector<32x32xbf16>
    %61 = arith.truncf %58 : vector<32x8xf32> to vector<32x8xbf16>
    %cst_44 = arith.constant dense<0.000000e+00> : vector<32x8xf32>
    %62 = tpu.matmul %60, %61, %cst_44 {dimension_numbers = #tpu.dot_dimension_numbers<[1], [0], [0], [1], [0, 0, 1, 1], [], []>} : vector<32x32xbf16>, vector<32x8xbf16>, vector<32x8xf32> -> vector<32x8xf32>
    %c5_45 = arith.constant 5 : index
    %c0_46 = arith.constant 0 : index
    %c0_47 = arith.constant 0 : index
    %63 = vector.load %arg5[%c5_45, %c0_46, %c0_47] : memref<7x32x1xf32, #tpu.memory_space<vmem>>, vector<1x32x1xf32>
    %64 = vector.shape_cast %63 : vector<1x32x1xf32> to vector<32x1xf32>
    %65 = vector.broadcast %64 : vector<32x1xf32> to vector<32x8xf32>
    %66 = arith.addf %62, %65 : vector<32x8xf32>
    %cst_48 = arith.constant 0.000000e+00 : f32
    %67 = vector.broadcast %cst_48 : f32 to vector<32x8xf32>
    %68 = arith.maximumf %66, %67 : vector<32x8xf32>
    %c6 = arith.constant 6 : index
    %c0_49 = arith.constant 0 : index
    %c0_50 = arith.constant 0 : index
    %69 = vector.load %arg4[%c6, %c0_49, %c0_50] : memref<7x32x32xbf16, #tpu.memory_space<vmem>>, vector<1x32x32xbf16>
    %70 = vector.shape_cast %69 : vector<1x32x32xbf16> to vector<32x32xbf16>
    %71 = arith.truncf %68 : vector<32x8xf32> to vector<32x8xbf16>
    %cst_51 = arith.constant dense<0.000000e+00> : vector<32x8xf32>
    %72 = tpu.matmul %70, %71, %cst_51 {dimension_numbers = #tpu.dot_dimension_numbers<[1], [0], [0], [1], [0, 0, 1, 1], [], []>} : vector<32x32xbf16>, vector<32x8xbf16>, vector<32x8xf32> -> vector<32x8xf32>
    %c6_52 = arith.constant 6 : index
    %c0_53 = arith.constant 0 : index
    %c0_54 = arith.constant 0 : index
    %73 = vector.load %arg5[%c6_52, %c0_53, %c0_54] : memref<7x32x1xf32, #tpu.memory_space<vmem>>, vector<1x32x1xf32>
    %74 = vector.shape_cast %73 : vector<1x32x1xf32> to vector<32x1xf32>
    %75 = vector.broadcast %74 : vector<32x1xf32> to vector<32x8xf32>
    %76 = arith.addf %72, %75 : vector<32x8xf32>
    %cst_55 = arith.constant 0.000000e+00 : f32
    %77 = vector.broadcast %cst_55 : f32 to vector<32x8xf32>
    %78 = arith.maximumf %76, %77 : vector<32x8xf32>
    %c0_56 = arith.constant 0 : index
    %c0_57 = arith.constant 0 : index
    %79 = vector.load %arg6[%c0_56, %c0_57] : memref<32x1xf32, #tpu.memory_space<vmem>>, vector<32x1xf32>
    %80 = vector.broadcast %79 : vector<32x1xf32> to vector<32x8xf32>
    %81 = arith.mulf %78, %80 : vector<32x8xf32>
    %cst_58 = arith.constant dense<0.000000e+00> : vector<8xf32>
    %82 = vector.multi_reduction <add>, %81, %cst_58 [0] : vector<32x8xf32> to vector<8xf32>
    %83 = vector.shape_cast %82 : vector<8xf32> to vector<1x8xf32>
    %c0_59 = arith.constant 0 : index
    %c0_60 = arith.constant 0 : index
    %84 = vector.load %arg7[%c0_59, %c0_60] : memref<1x1xf32, #tpu.memory_space<vmem>>, vector<1x1xf32>
    %85 = vector.broadcast %84 : vector<1x1xf32> to vector<1x8xf32>
    %86 = arith.addf %83, %85 : vector<1x8xf32>
    %87 = arith.negf %86 : vector<1x8xf32>
    %88 = math.exp %87 : vector<1x8xf32>
    %cst_61 = arith.constant 1.000000e+00 : f32
    %89 = vector.broadcast %cst_61 : f32 to vector<1x8xf32>
    %90 = arith.addf %89, %88 : vector<1x8xf32>
    %91 = arith.divf %89, %90 : vector<1x8xf32>
    %c0_62 = arith.constant 0 : index
    %c0_63 = arith.constant 0 : index
    %92 = vector.load %arg8[%c0_62, %c0_63] : memref<1x8xf32, #tpu.memory_space<vmem>>, vector<1x8xf32>
    tpu.vector_store %arg8[%c0_62, %c0_63], %91 {strides = array<i32>} : memref<1x8xf32, #tpu.memory_space<vmem>>, vector<1x8xf32>,
    return
  }
  func.func @transform_0(%arg0: i32) -> (i32, i32) {
    %c0_i32 = arith.constant 0 : i32
    %c0_i32_0 = arith.constant 0 : i32
    return %c0_i32, %arg0 : i32, i32
  }
  func.func @transform_1(%arg0: i32) -> (i32, i32) {
    %c0_i32 = arith.constant 0 : i32
    %c0_i32_0 = arith.constant 0 : i32
    %c0_i32_1 = arith.constant 0 : i32
    return %c0_i32, %c0_i32_0 : i32, i32
  }
  func.func @transform_2(%arg0: i32) -> (i32, i32) {
    %c0_i32 = arith.constant 0 : i32
    %c0_i32_0 = arith.constant 0 : i32
    %c0_i32_1 = arith.constant 0 : i32
    return %c0_i32, %c0_i32_0 : i32, i32
  }
  func.func @transform_3(%arg0: i32) -> (i32, i32, i32) {
    %c0_i32 = arith.constant 0 : i32
    %c0_i32_0 = arith.constant 0 : i32
    %c0_i32_1 = arith.constant 0 : i32
    %c0_i32_2 = arith.constant 0 : i32
    return %c0_i32, %c0_i32_0, %c0_i32_1 : i32, i32, i32
  }
  func.func @transform_4(%arg0: i32) -> (i32, i32, i32) {
    %c0_i32 = arith.constant 0 : i32
    %c0_i32_0 = arith.constant 0 : i32
    %c0_i32_1 = arith.constant 0 : i32
    %c0_i32_2 = arith.constant 0 : i32
    return %c0_i32, %c0_i32_0, %c0_i32_1 : i32, i32, i32
  }
  func.func @transform_5(%arg0: i32) -> (i32, i32) {
    %c0_i32 = arith.constant 0 : i32
    %c0_i32_0 = arith.constant 0 : i32
    %c0_i32_1 = arith.constant 0 : i32
    return %c0_i32, %c0_i32_0 : i32, i32
  }
  func.func @transform_6(%arg0: i32) -> (i32, i32) {
    %c0_i32 = arith.constant 0 : i32
    %c0_i32_0 = arith.constant 0 : i32
    %c0_i32_1 = arith.constant 0 : i32
    return %c0_i32, %c0_i32_0 : i32, i32
  }
  func.func @transform_7(%arg0: i32) -> (i32, i32) {
    %c0_i32 = arith.constant 0 : i32
    %c0_i32_0 = arith.constant 0 : i32
    return %c0_i32, %arg0 : i32, i32
  }
}

</mosaic_0001>

<bundles_post_ra>
// kernel: neural_network9_forward.1
= control target key start
LH: loop header
LB: loop body
LE: loop exit
PB: predicated region body
PF: predicated region fallthrough
CT: control target
= control target key end

     0   :  { %s1357_s0 = inlined_call_operand.vmem [shape: f32[4,8], index: 0, kind: input, shape index: {}]   ;;  %s1358_s1 = inlined_call_operand.vmem [shape: bf16[32,4], index: 1, kind: input, shape index: {}]   ;;  %s1359_s2 = inlined_call_operand.vmem [shape: f32[32,1], index: 2, kind: input, shape index: {}]   ;;  %s1360_s3 = inlined_call_operand.vmem [shape: bf16[7,32,32], index: 3, kind: input, shape index: {}]   ;;  %s1361_s4 = inlined_call_operand.vmem [shape: f32[7,32,1], index: 4, kind: input, shape index: {}]   ;;  %s1362_s5 = inlined_call_operand.vmem [shape: f32[32,1], index: 5, kind: input, shape index: {}]   ;;  %s1363_s6 = inlined_call_operand.<no memory space> [shape: f32[1,1], index: 6, kind: input, shape index: {}]   ;;  %s1364_s7 = inlined_call_operand.hbm [shape: f32[1,8], index: 7, kind: output, shape index: {}]  }
   0x1   :  { %v12_v0 = vstv %s1363_s6 }
   0x2   :  { %13 = vst [vmem:[#allocation2] sm:$0x1] %v12_v0 }
   0x3   :  { %v34_v1 = vld [vmem:[%s1357_s0] sm:$0xf]  ;;  %vm77_vm0 = vcmask 1041408   ;;  %v38_v2 = vld [vmem:[%s1359_s2 + $0x10] sm:$0xff]  ;;  %v1136_v4 = vmov 0   ;;  %vm70_vm1 = vcmask 31744  }
   0x4   :  { %v1094_v3 = vld [vmem:[%s1358_s1] sm:$0xff]   ;;  %1092 = vset.pattern.permute.xlu0 %v1136_v4  ;;  %v35_v5 = vpack.c.bf16 %v34_v1, %v34_v1  ;;  %1093 = vset.pattern.permute.xlu1 %v1136_v4  ;;  %v1095_v7 = vld [vmem:[%s1358_s1 + $0x8] sm:$0xff]   ;;  %v39_v8 = vld [vmem:[%s1359_s2 + $0x18] sm:$0xff] }
   0x5   :  { %52 = vperm.xlu0 %1092, %v38_v2   ;;  %1029 = vmatprep.mubr.msk.bf16.mxu0 %vm70_vm1, %v1094_v3  ;;  %v36_v9 = vld [vmem:[%s1359_s2] sm:$0xff]  ;;  %v37_v10 = vld [vmem:[%s1359_s2 + $0x8] sm:$0xff]  ;;  %v142_v11 = vld [vmem:[%s1361_s4 + $0x10] sm:$0xff] }
   0x6   :  { %1089 = vmatprep.subr.msk.bf16.mxu0 %vm77_vm0, %v35_v5  ;;  %v79_v6 = vsel %vm77_vm0, %v35_v5, 0  ;;  %42 = vperm.xlu1 %1093, %v36_v9   ;;  %v143_v12 = vld [vmem:[%s1361_s4 + $0x18] sm:$0xff]  ;;  %v140_v13 = vld [vmem:[%s1361_s4] sm:$0xff]  ;;  %v141_v14 = vld [vmem:[%s1361_s4 + $0x8] sm:$0xff] }
   0x7   :  { %1028 = vmatpush3.bf16.msra.mxu0 %v79_v6  ;;  %v929_v15 = vld [vmem:[%s1361_s4 + $0x30] sm:$0xff]  ;;  %v930_v16 = vld [vmem:[%s1361_s4 + $0x38] sm:$0xff]  ;;  %v927_v17 = vld [vmem:[%s1361_s4 + $0x20] sm:$0xff] }
   0x8   :  { %v928_v18 = vld [vmem:[%s1361_s4 + $0x28] sm:$0xff]  ;;  %v941_v19 = vld [vmem:[%s1361_s4 + $0x50] sm:$0xff] }
   0x9   :  { %57 = vperm.xlu0 %1092, %v39_v8  }
   0xa   :  { %1030 = vmatmul.mubr.msk.bf16.vlgmr.msra.gmra.mxu0 %vm70_vm1, %v1095_v7  ;;  %47 = vperm.xlu1 %1093, %v37_v10  }
   0xd   :  { %156 = vperm.xlu0 %1092, %v142_v11  }
   0xe   :  { %161 = vperm.xlu1 %1093, %v143_v12  }
  0x11   :  { %146 = vperm.xlu0 %1092, %v140_v13  }
  0x12   :  { %151 = vperm.xlu1 %1093, %v141_v14  }
  0x15   :  { %258 = vperm.xlu0 %1092, %v929_v15  }
  0x16   :  { %263 = vperm.xlu1 %1093, %v930_v16  }
  0x19   :  { %248 = vperm.xlu0 %1092, %v927_v17  }
  0x1a   :  { %253 = vperm.xlu1 %1093, %v928_v18  }
  0x1b   :  { %14 = vsyncpa [#allocation4], 0  ;;  %v942_v20 = vld [vmem:[%s1361_s4 + $0x58] sm:$0xff]  ;;  %v939_v21 = vld [vmem:[%s1361_s4 + $0x40] sm:$0xff]  ;;  %vm174_vm2 = vcmask 261120   ;;  %vm868_vm3 = vcmask 64512  }
  0x1c   :  { %v940_v22 = vld [vmem:[%s1361_s4 + $0x48] sm:$0xff]  ;;  %v953_v23 = vld [vmem:[%s1361_s4 + $0x70] sm:$0xff]  ;;  %v954_v24 = vld [vmem:[%s1361_s4 + $0x78] sm:$0xff]  ;;  %vm899_vm4 = vcmask 57344  }
  0x1d   :  { %359 = vperm.xlu0 %1092, %v941_v19   ;;  %v951_v25 = vld [vmem:[%s1361_s4 + $0x60] sm:$0xff]  ;;  %v952_v26 = vld [vmem:[%s1361_s4 + $0x68] sm:$0xff]  ;;  %v965_v27 = vld [vmem:[%s1361_s4 + $0x90] sm:$0xff] }
  0x1e   :  { %364 = vperm.xlu1 %1093, %v942_v20   ;;  %v966_v28 = vld [vmem:[%s1361_s4 + $0x98] sm:$0xff]  ;;  %v963_v29 = vld [vmem:[%s1361_s4 + $0x80] sm:$0xff]  ;;  %v964_v30 = vld [vmem:[%s1361_s4 + $0x88] sm:$0xff] }
  0x1f   :  { %v977_v31 = vld [vmem:[%s1361_s4 + $0xb0] sm:$0xff]  ;;  %v978_v32 = vld [vmem:[%s1361_s4 + $0xb8] sm:$0xff]  ;;  %v975_v33 = vld [vmem:[%s1361_s4 + $0xa0] sm:$0xff] }
  0x20   :  { %v976_v34 = vld [vmem:[%s1361_s4 + $0xa8] sm:$0xff]  ;;  %v987_v35 = vld [vmem:[%s1361_s4 + $0xc0] sm:$0xff]  ;;  %v989_v37 = vld [vmem:[%s1361_s4 + $0xd0] sm:$0xff] }
  0x21   :  { %349 = vperm.xlu0 %1092, %v939_v21   ;;  %v988_v36 = vld [vmem:[%s1361_s4 + $0xc8] sm:$0xff]  ;;  %v990_v38 = vld [vmem:[%s1361_s4 + $0xd8] sm:$0xff]  ;;  %v840_v39 = vld [vmem:[%s1362_s5] sm:$0xff] }
  0x22   :  { %354 = vperm.xlu1 %1093, %v940_v22   ;;  %v841_v40 = vld [vmem:[%s1362_s5 + $0x8] sm:$0xff]  ;;  %v842_v41 = vld [vmem:[%s1362_s5 + $0x10] sm:$0xff]  ;;  %v843_v42 = vld [vmem:[%s1362_s5 + $0x18] sm:$0xff] }
  0x23   :  { %v882_v43 = vld [vmem:[#allocation2] sm:$0x1]  ;;  %v1097_v63 = vld [vmem:[%s1360_s3 + $0x8] sm:$0xff]   ;;  %v1098_v0 = vld [vmem:[%s1360_s3 + $0x10] sm:$0xff]  }
  0x24   :  { %v1096_v44 = vld [vmem:[%s1360_s3] sm:$0xff]   ;;  %1045 = vmatprep.mubr.msk.bf16.mxu0 %vm174_vm2, %v1098_v0  ;;  %v1099_v19 = vld [vmem:[%s1360_s3 + $0x18] sm:$0xff]  }
  0x25   :  { %460 = vperm.xlu0 %1092, %v953_v23   ;;  %1037 = vmatprep.mubr.msk.bf16.mxu1 %vm174_vm2, %v1096_v44  ;;  %v1100_v20 = vld [vmem:[%s1360_s3 + $0x20] sm:$0xff]  }
  0x26   :  { %465 = vperm.xlu1 %1093, %v954_v24  }
  0x29   :  { %450 = vperm.xlu0 %1092, %v951_v25  }
  0x2a   :  { %455 = vperm.xlu1 %1093, %v952_v26  }
  0x2d   :  { %561 = vperm.xlu0 %1092, %v965_v27  }
  0x2e   :  { %566 = vperm.xlu1 %1093, %v966_v28  }
  0x31   :  { %551 = vperm.xlu0 %1092, %v963_v29  }
  0x32   :  { %556 = vperm.xlu1 %1093, %v964_v30  }
  0x35   :  { %662 = vperm.xlu0 %1092, %v977_v31  }
  0x36   :  { %667 = vperm.xlu1 %1093, %v978_v32  }
  0x39   :  { %652 = vperm.xlu0 %1092, %v975_v33  }
  0x3a   :  { %657 = vperm.xlu1 %1093, %v976_v34  }
  0x3d   :  { %753 = vperm.xlu0 %1092, %v987_v35  }
  0x3e   :  { %758 = vperm.xlu1 %1093, %v988_v36  }
  0x41   :  { %763 = vperm.xlu0 %1092, %v989_v37  }
  0x42   :  { %768 = vperm.xlu1 %1093, %v990_v38  }
  0x45   :  { %846 = vperm.xlu0 %1092, %v840_v39   ;;  %v1101_v39 = vld [vmem:[%s1360_s3 + $0x28] sm:$0xff]  }
  0x46   :  { %851 = vperm.xlu1 %1093, %v841_v40   ;;  %v1102_v40 = vld [vmem:[%s1360_s3 + $0x30] sm:$0xff]  }
  0x49   :  { %856 = vperm.xlu0 %1092, %v842_v41  }
  0x4a   :  { %861 = vperm.xlu1 %1093, %v843_v42  }
  0x4d   :  { %885 = vperm.xlu0 %1092, %v882_v43  }
  0x80   :  { %v53_v45 = vpop.permute.xlu0 %52 }
  0x81   :  { %v43_v46 = vpop.permute.xlu1 %42 }
  0x84   :  { %v58_v50 = vpop.permute.xlu0 %57 }
  0x85   :  { %v48_v54 = vpop.permute.xlu1 %47 }
  0x88   :  { %v157_v1 = vpop.permute.xlu0 %156 }
  0x89   :  { %v162_v2 = vpop.permute.xlu1 %161 }
  0x8c   :  { %v147_v6 = vpop.permute.xlu0 %146 }
  0x8d   :  { %v152_v10 = vpop.permute.xlu1 %151 }
  0x90   :  { %v259_v21 = vpop.permute.xlu0 %258 }
  0x91   :  { %v264_v22 = vpop.permute.xlu1 %263 }
  0x94   :  { %v249_v26 = vpop.permute.xlu0 %248 }
  0x95   :  { %v254_v30 = vpop.permute.xlu1 %253 }
  0x98   :  { %v360_v41 = vpop.permute.xlu0 %359 }
  0x99   :  { %v365_v42 = vpop.permute.xlu1 %364 }
  0xca   :  { %v1031_v47 = vpop.f32.mrf.mxu0 }
  0xcb   :  { %v124_v49 = vadd.f32 %v1031_v47, %v53_v45 }
  0xcc   :  { %v115_v48 = vpop.f32.mrf.mxu0 }
  0xcd   :  { %v116_v52 = vadd.f32 %v115_v48, %v43_v46  ;;  %v132_v56 = vmax.f32 %v124_v49, 0.0  ;;  %v350_v46 = vpop.permute.xlu0 %349 }
  0xce   :  { %v1032_v51 = vpop.f32.mrf.mxu0 }
  0xcf   :  { %v127_v53 = vadd.f32 %v1032_v51, %v58_v50  ;;  %v130_v59 = vmax.f32 %v116_v52, 0.0  ;;  %v355_v50 = vpop.permute.xlu1 %354 }
  0xd0   :  { %v118_v55 = vpop.f32.mrf.mxu0 }
  0xd1   :  { %v133_v57 = vmax.f32 %v127_v53, 0.0  ;;  %v119_v58 = vadd.f32 %v118_v55, %v48_v54 }
  0xd3   :  { %v131_v60 = vmax.f32 %v119_v58, 0.0  ;;  %v139_v61 = vpack.c.bf16 %v133_v57, %v132_v56 }
  0xd5   :  { %v138_v62 = vpack.c.bf16 %v131_v60, %v130_v59  ;;  %1033 = vmatprep.subr.bf16.mxu1 %v139_v61  ;;  %v1103_v59 = vld [vmem:[%s1360_s3 + $0x38] sm:$0xff]   ;;  %v1104_v60 = vld [vmem:[%s1360_s3 + $0x40] sm:$0xff]  }
  0xd6   :  { %1034 = vmatpush3.bf16.msra.mxu1 %v139_v61  ;;  %v461_v61 = vpop.permute.xlu0 %460 }
  0xd7   :  { %1035 = vmatprep.subr.bf16.mxu1 %v138_v62 }
  0xda   :  { %1036 = vmatpush3.bf16.msra.mxu1 %v138_v62  ;;  %v466_v62 = vpop.permute.xlu1 %465 }
  0xdd   :  { %1038 = vmatmul.mubr.msk.bf16.vlgmr.msra.gmra.mxu1 %vm174_vm2, %v1097_v63 }
  0xde   :  { %1053 = vmatprep.mubr.msk.bf16.mxu1 %vm174_vm2, %v1100_v20 }
 0x19d   :  { %v1039_v3 = vpop.f32.mrf.mxu1 }
 0x19e   :  { %v224_v5 = vadd.f32 %v1039_v3, %v157_v1 }
 0x19f   :  { %v215_v4 = vpop.f32.mrf.mxu1 }
 0x1a0   :  { %v216_v8 = vadd.f32 %v215_v4, %v147_v6  ;;  %v232_v12 = vmax.f32 %v224_v5, 0.0  ;;  %v456_v6 = vpop.permute.xlu1 %455 }
 0x1a1   :  { %v1040_v7 = vpop.f32.mrf.mxu1 }
 0x1a2   :  { %v227_v9 = vadd.f32 %v1040_v7, %v162_v2  ;;  %v230_v15 = vmax.f32 %v216_v8, 0.0  ;;  %v451_v2 = vpop.permute.xlu0 %450 }
 0x1a3   :  { %v218_v11 = vpop.f32.mrf.mxu1 }
 0x1a4   :  { %v233_v13 = vmax.f32 %v227_v9, 0.0  ;;  %v219_v14 = vadd.f32 %v218_v11, %v152_v10 }
 0x1a6   :  { %v240_v16 = vpack.c.bf16 %v233_v13, %v232_v12  ;;  %v231_v17 = vmax.f32 %v219_v14, 0.0 }
 0x1a8   :  { %v239_v18 = vpack.c.bf16 %v231_v17, %v230_v15  ;;  %1041 = vmatprep.subr.bf16.mxu0 %v240_v16  ;;  %v1105_v15 = vld [vmem:[%s1360_s3 + $0x48] sm:$0xff]   ;;  %v562_v17 = vpop.permute.xlu0 %561 }
 0x1a9   :  { %1042 = vmatpush3.bf16.msra.mxu0 %v240_v16  ;;  %v1106_v16 = vld [vmem:[%s1360_s3 + $0x50] sm:$0xff]  }
 0x1aa   :  { %1043 = vmatprep.subr.bf16.mxu0 %v239_v18 }
 0x1ad   :  { %1044 = vmatpush3.bf16.msra.mxu0 %v239_v18  ;;  %v567_v18 = vpop.permute.xlu1 %566 }
 0x1b0   :  { %1046 = vmatmul.mubr.msk.bf16.vlgmr.msra.gmra.mxu0 %vm174_vm2, %v1099_v19 }
 0x1b1   :  { %1061 = vmatprep.mubr.msk.bf16.mxu0 %vm174_vm2, %v1102_v40 }
 0x270   :  { %v1047_v23 = vpop.f32.mrf.mxu0 }
 0x271   :  { %v325_v25 = vadd.f32 %v1047_v23, %v259_v21 }
 0x272   :  { %v316_v24 = vpop.f32.mrf.mxu0 }
 0x273   :  { %v317_v28 = vadd.f32 %v316_v24, %v249_v26  ;;  %v333_v32 = vmax.f32 %v325_v25, 0.0  ;;  %v557_v26 = vpop.permute.xlu1 %556 }
 0x274   :  { %v1048_v27 = vpop.f32.mrf.mxu0 }
 0x275   :  { %v328_v29 = vadd.f32 %v1048_v27, %v264_v22  ;;  %v331_v35 = vmax.f32 %v317_v28, 0.0  ;;  %v552_v22 = vpop.permute.xlu0 %551 }
 0x276   :  { %v319_v31 = vpop.f32.mrf.mxu0 }
 0x277   :  { %v334_v33 = vmax.f32 %v328_v29, 0.0  ;;  %v320_v34 = vadd.f32 %v319_v31, %v254_v30 }
 0x279   :  { %v341_v36 = vpack.c.bf16 %v334_v33, %v333_v32  ;;  %v332_v37 = vmax.f32 %v320_v34, 0.0 }
 0x27b   :  { %v340_v38 = vpack.c.bf16 %v332_v37, %v331_v35  ;;  %1049 = vmatprep.subr.bf16.mxu1 %v341_v36  ;;  %v1107_v35 = vld [vmem:[%s1360_s3 + $0x58] sm:$0xff]   ;;  %v663_v37 = vpop.permute.xlu0 %662 }
 0x27c   :  { %1050 = vmatpush3.bf16.msra.mxu1 %v341_v36  ;;  %v1108_v36 = vld [vmem:[%s1360_s3 + $0x60] sm:$0xff]  }
 0x27d   :  { %1051 = vmatprep.subr.bf16.mxu1 %v340_v38 }
 0x280   :  { %1052 = vmatpush3.bf16.msra.mxu1 %v340_v38  ;;  %v668_v38 = vpop.permute.xlu1 %667 }
 0x283   :  { %1054 = vmatmul.mubr.msk.bf16.vlgmr.msra.gmra.mxu1 %vm174_vm2, %v1101_v39 }
 0x284   :  { %1069 = vmatprep.mubr.msk.bf16.mxu1 %vm174_vm2, %v1104_v60 }
 0x343   :  { %v1055_v43 = vpop.f32.mrf.mxu1 }
 0x344   :  { %v426_v45 = vadd.f32 %v1055_v43, %v360_v41 }
 0x345   :  { %v417_v44 = vpop.f32.mrf.mxu1 }
 0x346   :  { %v418_v48 = vadd.f32 %v417_v44, %v350_v46  ;;  %v434_v52 = vmax.f32 %v426_v45, 0.0  ;;  %v658_v46 = vpop.permute.xlu1 %657 }
 0x347   :  { %v1056_v47 = vpop.f32.mrf.mxu1 }
 0x348   :  { %v429_v49 = vadd.f32 %v1056_v47, %v365_v42  ;;  %v432_v55 = vmax.f32 %v418_v48, 0.0  ;;  %v653_v42 = vpop.permute.xlu0 %652 }
 0x349   :  { %v420_v51 = vpop.f32.mrf.mxu1 }
 0x34a   :  { %v435_v53 = vmax.f32 %v429_v49, 0.0  ;;  %v421_v54 = vadd.f32 %v420_v51, %v355_v50 }
 0x34c   :  { %v442_v56 = vpack.c.bf16 %v435_v53, %v434_v52  ;;  %v433_v57 = vmax.f32 %v421_v54, 0.0 }
 0x34e   :  { %v441_v58 = vpack.c.bf16 %v433_v57, %v432_v55  ;;  %1057 = vmatprep.subr.bf16.mxu0 %v442_v56  ;;  %v1109_v55 = vld [vmem:[%s1360_s3 + $0x68] sm:$0xff]   ;;  %v759_v57 = vpop.permute.xlu1 %758  ;;  %s1137_s3 = smov [#allocation3]  }
 0x34f   :  { %1058 = vmatpush3.bf16.msra.mxu0 %v442_v56  ;;  %v754_v56 = vpop.permute.xlu0 %753  ;;  %s907_s22 = sshll.u32 %s1137_s3, 4  ;;  %s908_s22 = int_to_ptr.vmem [resolvable:$true] %s907_s22 }
 0x350   :  { %1059 = vmatprep.subr.bf16.mxu0 %v441_v58  ;;  %s1114_s4 = scalar_lea.vmem %s908_s22, 16  ;;  %s1118_s23 = scalar_lea.vmem %s908_s22, 32 }
 0x351   :  { %p1115_p0 = scmp.ne.s32.totalorder %s908_s22, %s1114_s4  ;;  %p1119_p1 = scmp.lt.s32.totalorder %s908_s22, %s908_s22 }
 0x352   :  { %p1120_p2 = scmp.lt.s32.totalorder %s1118_s23, %s1114_s4 }
 0x353   :  { %1060 = vmatpush3.bf16.msra.mxu0 %v441_v58  ;;  %v764_v58 = vpop.permute.xlu0 %763 }
 0x354   :  { %p1121_p3 = por %p1120_p2, %p1119_p1 }
 0x356   :  { %1062 = vmatmul.mubr.msk.bf16.vlgmr.msra.gmra.mxu0 %vm174_vm2, %v1103_v59  ;;  %v769_v59 = vpop.permute.xlu1 %768  ;;  %p1122_p4 = pnand %p1121_p3, %p1115_p0 }
 0x357   :  { %1077 = vmatprep.mubr.msk.bf16.mxu0 %vm174_vm2, %v1106_v16 }
 0x416   :  { %v1063_v63 = vpop.f32.mrf.mxu0 }
 0x417   :  { %v527_v1 = vadd.f32 %v1063_v63, %v461_v61 }
 0x418   :  { %v518_v0 = vpop.f32.mrf.mxu0 }
 0x419   :  { %v519_v4 = vadd.f32 %v518_v0, %v451_v2  ;;  %v535_v8 = vmax.f32 %v527_v1, 0.0  ;;  %v847_v0 = vpop.permute.xlu0 %846 }
 0x41a   :  { %v1064_v3 = vpop.f32.mrf.mxu0 }
 0x41b   :  { %v530_v5 = vadd.f32 %v1064_v3, %v466_v62  ;;  %v533_v11 = vmax.f32 %v519_v4, 0.0  ;;  %v852_v4 = vpop.permute.xlu1 %851 }
 0x41c   :  { %v521_v7 = vpop.f32.mrf.mxu0 }
 0x41d   :  { %v536_v9 = vmax.f32 %v530_v5, 0.0  ;;  %v522_v10 = vadd.f32 %v521_v7, %v456_v6 }
 0x41f   :  { %v543_v12 = vpack.c.bf16 %v536_v9, %v535_v8  ;;  %v534_v13 = vmax.f32 %v522_v10, 0.0 }
 0x421   :  { %v542_v14 = vpack.c.bf16 %v534_v13, %v533_v11  ;;  %1065 = vmatprep.subr.bf16.mxu1 %v543_v12  ;;  %v857_v11 = vpop.permute.xlu0 %856 }
 0x422   :  { %1066 = vmatpush3.bf16.msra.mxu1 %v543_v12 }
 0x423   :  { %1067 = vmatprep.subr.bf16.mxu1 %v542_v14 }
 0x426   :  { %1068 = vmatpush3.bf16.msra.mxu1 %v542_v14  ;;  %v862_v14 = vpop.permute.xlu1 %861 }
 0x429   :  { %1070 = vmatmul.mubr.msk.bf16.vlgmr.msra.gmra.mxu1 %vm174_vm2, %v1105_v15 }
 0x42a   :  { %1085 = vmatprep.mubr.msk.bf16.mxu1 %vm174_vm2, %v1108_v36 }
 0x4e9   :  { %v1071_v19 = vpop.f32.mrf.mxu1 }
 0x4ea   :  { %v628_v21 = vadd.f32 %v1071_v19, %v562_v17 }
 0x4eb   :  { %v619_v20 = vpop.f32.mrf.mxu1 }
 0x4ec   :  { %v620_v24 = vadd.f32 %v619_v20, %v552_v22  ;;  %v636_v28 = vmax.f32 %v628_v21, 0.0  ;;  %v888_v22 = vlaneseq }
 0x4ed   :  { %v1072_v23 = vpop.f32.mrf.mxu1 }
 0x4ee   :  { %v631_v25 = vadd.f32 %v1072_v23, %v567_v18  ;;  %v634_v31 = vmax.f32 %v620_v24, 0.0 }
 0x4ef   :  { %v622_v27 = vpop.f32.mrf.mxu1 }
 0x4f0   :  { %v637_v29 = vmax.f32 %v631_v25, 0.0  ;;  %v623_v30 = vadd.f32 %v622_v27, %v557_v26  ;;  %v889_v25 = vshrl.u32 %v888_v22, 7 }
 0x4f2   :  { %v644_v32 = vpack.c.bf16 %v637_v29, %v636_v28  ;;  %v635_v33 = vmax.f32 %v623_v30, 0.0  ;;  %v890_v28 = vsub.s32 0, %v889_v25  ;;  %v886_v30 = vpop.permute.xlu0 %885 }
 0x4f4   :  { %v643_v34 = vpack.c.bf16 %v635_v33, %v634_v31  ;;  %1073 = vmatprep.subr.bf16.mxu0 %v644_v32 }
 0x4f5   :  { %1074 = vmatpush3.bf16.msra.mxu0 %v644_v32  ;;  %v891_v32 = vrot.slane %v886_v30, %v890_v28 }
 0x4f6   :  { %1075 = vmatprep.subr.bf16.mxu0 %v643_v34 }
 0x4f9   :  { %1076 = vmatpush3.bf16.msra.mxu0 %v643_v34 }
 0x4fc   :  { %1078 = vmatmul.mubr.msk.bf16.vlgmr.msra.gmra.mxu0 %vm174_vm2, %v1107_v35 }
 0x5bc   :  { %v1079_v39 = vpop.f32.mrf.mxu0 }
 0x5bd   :  { %v729_v41 = vadd.f32 %v1079_v39, %v663_v37 }
 0x5be   :  { %v720_v40 = vpop.f32.mrf.mxu0 }
 0x5bf   :  { %v721_v44 = vadd.f32 %v720_v40, %v653_v42  ;;  %v737_v48 = vmax.f32 %v729_v41, 0.0 }
 0x5c0   :  { %v1080_v43 = vpop.f32.mrf.mxu0 }
 0x5c1   :  { %v732_v45 = vadd.f32 %v1080_v43, %v668_v38  ;;  %v735_v51 = vmax.f32 %v721_v44, 0.0 }
 0x5c2   :  { %v723_v47 = vpop.f32.mrf.mxu0 }
 0x5c3   :  { %v738_v49 = vmax.f32 %v732_v45, 0.0  ;;  %v724_v50 = vadd.f32 %v723_v47, %v658_v46 }
 0x5c5   :  { %v745_v52 = vpack.c.bf16 %v738_v49, %v737_v48  ;;  %v736_v53 = vmax.f32 %v724_v50, 0.0 }
 0x5c7   :  { %v744_v54 = vpack.c.bf16 %v736_v53, %v735_v51  ;;  %1081 = vmatprep.subr.bf16.mxu1 %v745_v52 }
 0x5c8   :  { %1082 = vmatpush3.bf16.msra.mxu1 %v745_v52 }
 0x5c9   :  { %1083 = vmatprep.subr.bf16.mxu1 %v744_v54 }
 0x5cc   :  { %1084 = vmatpush3.bf16.msra.mxu1 %v744_v54 }
 0x5cf   :  { %1086 = vmatmul.mubr.msk.bf16.vlgmr.msra.gmra.mxu1 %vm174_vm2, %v1109_v55 }
 0x68f   :  { %v1087_v60 = vpop.f32.mrf.mxu1 }
 0x690   :  { %v830_v62 = vadd.f32 %v1087_v60, %v764_v58 }
 0x691   :  { %v821_v61 = vpop.f32.mrf.mxu1 }
 0x692   :  { %v822_v63 = vadd.f32 %v821_v61, %v754_v56  ;;  %v838_v6 = vmax.f32 %v830_v62, 0.0 }
 0x693   :  { %v1088_v1 = vpop.f32.mrf.mxu1 }
 0x694   :  { %v836_v2 = vmax.f32 %v822_v63, 0.0  ;;  %v833_v3 = vadd.f32 %v1088_v1, %v769_v59  ;;  %v866_v12 = vmul.f32 %v857_v11, %v838_v6 }
 0x695   :  { %v824_v5 = vpop.f32.mrf.mxu1 }
 0x696   :  { %v825_v7 = vadd.f32 %v824_v5, %v759_v57  ;;  %v864_v8 = vmul.f32 %v847_v0, %v836_v2  ;;  %v839_v9 = vmax.f32 %v833_v3, 0.0  ;;  %v872_v19 = vsel %vm868_vm3, %v866_v12, 0.0 }
 0x698   :  { %v837_v10 = vmax.f32 %v825_v7, 0.0  ;;  %v869_v15 = vsel %vm868_vm3, %v864_v8, 0.0  ;;  %v867_v16 = vmul.f32 %v862_v14, %v839_v9 }
 0x69a   :  { %v865_v13 = vmul.f32 %v852_v4, %v837_v10  ;;  %v874_v21 = vsel %vm868_vm3, %v867_v16, 0.0 }
 0x69c   :  { %v870_v17 = vsel %vm868_vm3, %v865_v13, 0.0 }
 0x69d   :  { %v871_v18 = vadd.f32 %v870_v17, %v869_v15 }
 0x69f   :  { %v873_v20 = vadd.f32 %v872_v19, %v871_v18 }
 0x6a1   :  { %v875_v23 = vadd.f32 %v874_v21, %v873_v20 }
 0x6a3   :  { %v876_v24 = vrot.slane %v875_v23, 4 }
 0x6a5   :  { %v877_v26 = vadd.f32 %v876_v24, %v875_v23 }
 0x6a7   :  { %v878_v27 = vrot.slane %v877_v26, 2 }
 0x6a9   :  { %v879_v29 = vadd.f32 %v878_v27, %v877_v26 }
 0x6ab   :  { %v880_v31 = vrot.slane %v879_v29, 1 }
 0x6ad   :  { %v881_v33 = vadd.f32 %v880_v31, %v879_v29 }
 0x6af   :  { %v892_v34 = vadd.f32 %v891_v32, %v881_v33 }
 0x6b1   :  { %v995_v35 = vmul.f32 -1.442695, %v892_v34 }
 0x6b3   :  { %1110 = vpow2.f32 %v995_v35 }
 0x6c0   :  { %v1111_v36 = vpop.eup %1110 }
 0x6c1   :  { %v896_v37 = vadd.f32 1.0, %v1111_v36 }
 0x6c3   :  { %1112 = vrcp.f32 %v896_v37 }
 0x6d0   :  { %v1113_v38 = vpop.eup %1112 }
 0x6d1   :  { %900 = vst.msk [vmem:[#allocation3] sm:$0x1] %vm899_vm4, %v1113_v38 }
 0x6d2   :  { %1125 = shalt.err (!%p1122_p4)
}
 0x6d3   :  { %910 = dma.vmem_to_hbm [thread:$0]  %s908_s22, 16, %s1364_s7, [#allocation4]  }
 0x6d4   :  { %1134 = dma.done.wait [#allocation4], 16  }
 0x6d5   :  { %1135 = vsyncadd [#allocation4], 4294967280 }
 0x6d6   :  { %914 = vsyncpa [#allocation4], 1 }

</bundles_post_ra>
